<compile_context>
chip_gen: v7x
topology: tpu7x:2x2x1
jax: 0.10.0
libtpu: 0.0.40
codegen_flags: <defaults>
</compile_context>

<pallas_src>
import functools

import jax
import jax.numpy as jnp
from jax.experimental import pallas as pl
from jax.experimental.pallas import tpu as pltpu

EPS = 1e-5  # InstanceNorm2d default eps


def _round_up(x, m):
    return ((x + m - 1) // m) * m


def _pick_tile(total, max_tile, align):
    """Tile size <= max_tile (multiple of `align`), padded total, #tiles."""
    total_a = _round_up(total, align)
    n = -(-total_a // max_tile)
    tile = _round_up(-(-total_a // n), align)
    return tile, tile * n, n


def _vmem_limit_bytes():
    # ~3/4 of physical VMEM, capped: 96 MiB on v5e/v6e (128 MiB), 48 MiB on v7x (64 MiB).
    try:
        cap = pltpu.get_tpu_info().vmem_capacity_bytes
    except Exception:
        cap = 64 * 1024 * 1024
    return int(min(96 * 1024 * 1024, max(32 * 1024 * 1024, (cap * 3) // 4)))


def _im2col_nchw(x, KH, KW, stride, padding, dilation):
    """x: [N, Cin, H, W] -> patches [N, KH*KW*Cin, Hout*Wout] (K-major, HW on lanes)."""
    N, Cin, H, W = x.shape
    H_eff = (KH - 1) * dilation + 1
    W_eff = (KW - 1) * dilation + 1
    H_out = (H + 2 * padding - H_eff) // stride + 1
    W_out = (W + 2 * padding - W_eff) // stride + 1
    xp = jnp.pad(x, ((0, 0), (0, 0), (padding, padding), (padding, padding)))
    slabs = []
    for kh in range(KH):
        for kw in range(KW):
            h0 = kh * dilation
            w0 = kw * dilation
            slab = xp[:, :, h0:h0 + (H_out - 1) * stride + 1:stride,
                            w0:w0 + (W_out - 1) * stride + 1:stride]  # [N,Cin,Ho,Wo]
            slabs.append(slab.reshape(N, Cin, H_out * W_out))
    # K ordering is (kh, kw, cin) to match the reshaped weight.
    return jnp.concatenate(slabs, axis=1), H_out, W_out


def _conv_stats_kernel(p_ref, w_ref, y_ref, sum_ref, ssq_ref):
    # p_ref:   (1, K_T, HW_T)     patches tile (native dtype)
    # w_ref:   (n_k, C_pad, K_T)  full weight, VMEM-resident (constant index_map)
    # y_ref:   (1, C_pad, HW_T)   f32 conv output; doubles as the K accumulator
    # sum_ref: (1, 1, C_pad, 1)   per-(n, hw-tile) partial sum over HW
    # ssq_ref: (1, 1, C_pad, 1)   per-(n, hw-tile) partial sum of squares
    k = pl.program_id(2)

    @pl.when(k == 0)
    def _():
        y_ref[...] = jnp.zeros_like(y_ref)

    y_ref[0] += jnp.dot(w_ref[k], p_ref[0], preferred_element_type=jnp.float32)

    @pl.when(k == pl.num_programs(2) - 1)
    def _():
        y = y_ref[0]
        sum_ref[0, 0] = jnp.sum(y, axis=1, keepdims=True)       # (C_pad, 1)
        ssq_ref[0, 0] = jnp.sum(y * y, axis=1, keepdims=True)   # (C_pad, 1)


def _norm_relu_kernel(y_ref, mean_ref, rstd_ref, o_ref, *, apply_insn, apply_relu):
    # y_ref: (1, C_pad, HW_T) f32; mean_ref/rstd_ref: (1, C_pad, 1) f32.
    y = y_ref[0]
    if apply_insn:
        y = (y - mean_ref[0]) * rstd_ref[0]
    if apply_relu:
        y = jnp.maximum(y, 0.0)
    o_ref[0] = y.astype(o_ref.dtype)


def basic_conv(x, weight, *, stride=1, padding=0, dilation=1,
               relu=True, insn=True, hw_tile=1024, k_tile=1024):
    """BasicConv forward. x: [N, Cin, H, W] (NCHW), weight: [Cout, Cin, KH, KW].

    Returns [N, Cout, Hout, Wout]. Conv has no bias; groups=1 (module defaults).
    """
    # TODO(synk): groups > 1 and conv bias not implemented (module defaults:
    # groups=1, bias=False).
    N, Cin, H, W = x.shape
    Cout, _, KH, KW = weight.shape

    patches, H_out, W_out = _im2col_nchw(x, KH, KW, stride, padding, dilation)
    HW = H_out * W_out
    K = KH * KW * Cin

    # Weight as (Cout, K) with the same (kh, kw, cin) K ordering as `patches`.
    w2d = jnp.transpose(weight, (0, 2, 3, 1)).reshape(Cout, K).astype(x.dtype)

    C_pad = _round_up(max(Cout, 128), 128)
    if N == 1 and HW > 128:
        # Give both v7x TensorCores at least one spatial tile even when N == 1.
        hw_tile = min(hw_tile, max(128, _round_up(-(-HW // 2), 128)))
    K_T, K_pad, n_k = _pick_tile(K, k_tile, 128)
    HW_T, HW_pad, n_hw = _pick_tile(HW, hw_tile, 128)

    patches = jnp.pad(patches, ((0, 0), (0, K_pad - K), (0, HW_pad - HW)))
    w2d = jnp.pad(w2d, ((0, C_pad - Cout), (0, K_pad - K)))
    # Pre-split K so the kernel can index the resident weight with w_ref[k]
    # (dynamic leading-axis index) instead of re-DMA-ing a tile per grid step.
    w3d = jnp.transpose(w2d.reshape(C_pad, n_k, K_T), (1, 0, 2))  # (n_k, C_pad, K_T)

    vmem = _vmem_limit_bytes()

    # Pass 1: tiled transposed GEMM y(C, HW) = W @ P, plus per-tile partial
    # InstanceNorm statistics. HW sits on lanes; the f32 output block is the
    # K accumulator; the weight is VMEM-resident for the whole grid.
    y_conv, psum, pssq = pl.pallas_call(
        _conv_stats_kernel,
        out_shape=(
            jax.ShapeDtypeStruct((N, C_pad, HW_pad), jnp.float32),
            jax.ShapeDtypeStruct((N, n_hw, C_pad, 1), jnp.float32),
            jax.ShapeDtypeStruct((N, n_hw, C_pad, 1), jnp.float32),
        ),
        grid_spec=pltpu.PrefetchScalarGridSpec(
            num_scalar_prefetch=0,
            grid=(N, n_hw, n_k),
            in_specs=[
                pl.BlockSpec((1, K_T, HW_T), lambda n, h, k: (n, k, h)),
                pl.BlockSpec((n_k, C_pad, K_T), lambda n, h, k: (0, 0, 0)),
            ],
            out_specs=(
                pl.BlockSpec((1, C_pad, HW_T), lambda n, h, k: (n, 0, h)),
                pl.BlockSpec((1, 1, C_pad, 1), lambda n, h, k: (n, h, 0, 0)),
                pl.BlockSpec((1, 1, C_pad, 1), lambda n, h, k: (n, h, 0, 0)),
            ),
        ),
        compiler_params=pltpu.CompilerParams(
            dimension_semantics=("parallel", "parallel", "arbitrary"),
            vmem_limit_bytes=vmem),
    )(patches, w3d)

    # Combine partial stats over the FULL H*W (padded HW columns contribute 0).
    if insn:
        sums = jnp.sum(psum[..., 0], axis=1)           # (N, C_pad)
        ssqs = jnp.sum(pssq[..., 0], axis=1)           # (N, C_pad)
        mean = sums / float(HW)
        var = jnp.maximum(ssqs / float(HW) - mean * mean, 0.0)  # biased variance
        rstd = jax.lax.rsqrt(var + EPS)
    else:
        mean = jnp.zeros((N, C_pad), jnp.float32)
        rstd = jnp.ones((N, C_pad), jnp.float32)
    mean = mean[:, :, None]   # (N, C_pad, 1)
    rstd = rstd[:, :, None]

    # Pass 2: (y - mean) * rstd and ReLU. Output is already channel-major
    # (NCHW-flat), so no trailing XLA transpose is needed.
    out = pl.pallas_call(
        functools.partial(_norm_relu_kernel, apply_insn=insn, apply_relu=relu),
        out_shape=jax.ShapeDtypeStruct((N, C_pad, HW_pad), x.dtype),
        grid_spec=pltpu.PrefetchScalarGridSpec(
            num_scalar_prefetch=0,
            grid=(N, n_hw),
            in_specs=[
                pl.BlockSpec((1, C_pad, HW_T), lambda n, h: (n, 0, h)),
                pl.BlockSpec((1, C_pad, 1), lambda n, h: (n, 0, 0)),
                pl.BlockSpec((1, C_pad, 1), lambda n, h: (n, 0, 0)),
            ],
            out_specs=pl.BlockSpec((1, C_pad, HW_T), lambda n, h: (n, 0, h)),
        ),
        compiler_params=pltpu.CompilerParams(
            dimension_semantics=("parallel", "parallel"),
            vmem_limit_bytes=vmem),
    )(y_conv, mean, rstd)

    return out[:, :Cout, :HW].reshape(N, Cout, H_out, W_out)


if __name__ == "__main__":
    key = jax.random.PRNGKey(0)
    kx, kw = jax.random.split(key)
    N, Cin, H, W = 2, 4, 16, 16
    Cout, KH, KW = 8, 3, 3

    x = jax.random.normal(kx, (N, Cin, H, W), dtype=jnp.float32)
    fan_in = Cin * KH * KW
    bound = 1.0 / (fan_in ** 0.5)
    weight = jax.random.uniform(kw, (Cout, Cin, KH, KW),
                                minval=-bound, maxval=bound, dtype=jnp.float32)

    y = basic_conv(x, weight, stride=1, padding=1, dilation=1)
    jax.block_until_ready(y)

    # Pure-JAX reference: conv + InstanceNorm2d(affine=False) + ReLU.
    y_ref = jax.lax.conv_general_dilated(
        x, weight, window_strides=(1, 1), padding=((1, 1), (1, 1)),
        dimension_numbers=("NCHW", "OIHW", "NCHW"))
    mean = jnp.mean(y_ref, axis=(2, 3), keepdims=True)
    var = jnp.mean((y_ref - mean) ** 2, axis=(2, 3), keepdims=True)
    y_ref = jnp.maximum((y_ref - mean) / jnp.sqrt(var + EPS), 0.0)
    assert y.shape == y_ref.shape, "shape mismatch vs reference"
    assert jnp.allclose(y, y_ref, atol=2e-4, rtol=2e-4), "mismatch vs reference"

    print("KERNEL_OK")
</pallas_src>

<mosaic_0001>
module attributes {stable_mosaic.version = 11 : i64} {
  func.func @_conv_stats_kernel(%arg0: i32, %arg1: i32, %arg2: i32, %arg3: memref<1x128x256xf32, #tpu.memory_space<vmem>>, %arg4: memref<1x128x128xf32, #tpu.memory_space<vmem>>, %arg5: memref<1x128x256xf32, #tpu.memory_space<vmem>>, %arg6: memref<1x1x128x1xf32, #tpu.memory_space<vmem>>, %arg7: memref<1x1x128x1xf32, #tpu.memory_space<vmem>>) attributes {dimension_semantics = [#tpu.dimension_semantics<parallel>, #tpu.dimension_semantics<parallel>, #tpu.dimension_semantics<arbitrary>], iteration_bounds = array<i64: 2, 1, 1>, scalar_prefetch = 0 : i64, scratch_operands = 0 : i64, tpu.core_type = #tpu.core_type<tc>, window_params = [{transform_indices = @transform_0, window_bounds = array<i64: 1, 128, 256>}, {pipeline_mode = #tpu.pipeline_mode<synchronous>, transform_indices = @transform_1, window_bounds = array<i64: 1, 128, 128>}, {transform_indices = @transform_2, window_bounds = array<i64: 1, 128, 256>}, {transform_indices = @transform_3, window_bounds = array<i64: 1, 1, 128, 1>}, {transform_indices = @transform_4, window_bounds = array<i64: 1, 1, 128, 1>}]} {
    %c0_i32 = arith.constant 0 : i32
    %0 = arith.cmpi eq, %arg2, %c0_i32 : i32
    %1 = arith.extui %0 : i1 to i32
    %c0_i32_0 = arith.constant 0 : i32
    %2 = arith.cmpi ne, %1, %c0_i32_0 : i32
    scf.if %2 {
      %cst_13 = arith.constant 0.000000e+00 : f32
      %18 = vector.broadcast %cst_13 : f32 to vector<1x128x256xf32>
      %c0_14 = arith.constant 0 : index
      %c0_15 = arith.constant 0 : index
      %c0_16 = arith.constant 0 : index
      %19 = vector.load %arg5[%c0_14, %c0_15, %c0_16] : memref<1x128x256xf32, #tpu.memory_space<vmem>>, vector<1x128x256xf32>
      tpu.vector_store %arg5[%c0_14, %c0_15, %c0_16], %18 {strides = array<i32>} : memref<1x128x256xf32, #tpu.memory_space<vmem>>, vector<1x128x256xf32>,
    } else {
    }
    %c0 = arith.constant 0 : index
    %c0_1 = arith.constant 0 : index
    %c0_2 = arith.constant 0 : index
    %3 = vector.load %arg5[%c0, %c0_1, %c0_2] : memref<1x128x256xf32, #tpu.memory_space<vmem>>, vector<1x128x256xf32>
    %4 = vector.shape_cast %3 : vector<1x128x256xf32> to vector<128x256xf32>
    %5 = arith.index_cast %arg2 : i32 to index
    %c0_3 = arith.constant 0 : index
    %c0_4 = arith.constant 0 : index
    %6 = vector.load %arg4[%5, %c0_3, %c0_4] : memref<1x128x128xf32, #tpu.memory_space<vmem>>, vector<1x128x128xf32>
    %7 = vector.shape_cast %6 : vector<1x128x128xf32> to vector<128x128xf32>
    %c0_5 = arith.constant 0 : index
    %c0_6 = arith.constant 0 : index
    %c0_7 = arith.constant 0 : index
    %8 = vector.load %arg3[%c0_5, %c0_6, %c0_7] : memref<1x128x256xf32, #tpu.memory_space<vmem>>, vector<1x128x256xf32>
    %9 = vector.shape_cast %8 : vector<1x128x256xf32> to vector<128x256xf32>
    %cst = arith.constant dense<0.000000e+00> : vector<128x256xf32>
    %10 = tpu.matmul %7, %9, %cst {dimension_numbers = #tpu.dot_dimension_numbers<[1], [0], [0], [1], [0, 0, 1, 1], [], []>} : vector<128x128xf32>, vector<128x256xf32>, vector<128x256xf32> -> vector<128x256xf32>
    %11 = arith.addf %4, %10 : vector<128x256xf32>
    %c0_8 = arith.constant 0 : index
    %c0_9 = arith.constant 0 : index
    %c0_10 = arith.constant 0 : index
    %12 = vector.load %arg5[%c0_8, %c0_9, %c0_10] : memref<1x128x256xf32, #tpu.memory_space<vmem>>, vector<1x128x256xf32>
    %13 = vector.shape_cast %12 : vector<1x128x256xf32> to vector<128x256xf32>
    %14 = vector.shape_cast %11 : vector<128x256xf32> to vector<1x128x256xf32>
    tpu.vector_store %arg5[%c0_8, %c0_9, %c0_10], %14 {strides = array<i32>} : memref<1x128x256xf32, #tpu.memory_space<vmem>>, vector<1x128x256xf32>,
    %c0_i32_11 = arith.constant 0 : i32
    %15 = arith.cmpi eq, %arg2, %c0_i32_11 : i32
    %16 = arith.extui %15 : i1 to i32
    %c0_i32_12 = arith.constant 0 : i32
    %17 = arith.cmpi ne, %16, %c0_i32_12 : i32
    scf.if %17 {
      %c0_13 = arith.constant 0 : index
      %c0_14 = arith.constant 0 : index
      %c0_15 = arith.constant 0 : index
      %18 = vector.load %arg5[%c0_13, %c0_14, %c0_15] : memref<1x128x256xf32, #tpu.memory_space<vmem>>, vector<1x128x256xf32>
      %19 = vector.shape_cast %18 : vector<1x128x256xf32> to vector<128x256xf32>
      %cst_16 = arith.constant dense<0.000000e+00> : vector<128xf32>
      %20 = vector.multi_reduction <add>, %19, %cst_16 [1] : vector<128x256xf32> to vector<128xf32>
      %21 = vector.shape_cast %20 : vector<128xf32> to vector<128x1xf32>
      %c0_17 = arith.constant 0 : index
      %c0_18 = arith.constant 0 : index
      %c0_19 = arith.constant 0 : index
      %c0_20 = arith.constant 0 : index
      %22 = vector.load %arg6[%c0_17, %c0_18, %c0_19, %c0_20] : memref<1x1x128x1xf32, #tpu.memory_space<vmem>>, vector<1x1x128x1xf32>
      %23 = vector.shape_cast %22 : vector<1x1x128x1xf32> to vector<128x1xf32>
      %24 = vector.shape_cast %21 : vector<128x1xf32> to vector<1x1x128x1xf32>
      tpu.vector_store %arg6[%c0_17, %c0_18, %c0_19, %c0_20], %24 {strides = array<i32>} : memref<1x1x128x1xf32, #tpu.memory_space<vmem>>, vector<1x1x128x1xf32>,
      %25 = arith.mulf %19, %19 : vector<128x256xf32>
      %cst_21 = arith.constant dense<0.000000e+00> : vector<128xf32>
      %26 = vector.multi_reduction <add>, %25, %cst_21 [1] : vector<128x256xf32> to vector<128xf32>
      %27 = vector.shape_cast %26 : vector<128xf32> to vector<128x1xf32>
      %c0_22 = arith.constant 0 : index
      %c0_23 = arith.constant 0 : index
      %c0_24 = arith.constant 0 : index
      %c0_25 = arith.constant 0 : index
      %28 = vector.load %arg7[%c0_22, %c0_23, %c0_24, %c0_25] : memref<1x1x128x1xf32, #tpu.memory_space<vmem>>, vector<1x1x128x1xf32>
      %29 = vector.shape_cast %28 : vector<1x1x128x1xf32> to vector<128x1xf32>
      %30 = vector.shape_cast %27 : vector<128x1xf32> to vector<1x1x128x1xf32>
      tpu.vector_store %arg7[%c0_22, %c0_23, %c0_24, %c0_25], %30 {strides = array<i32>} : memref<1x1x128x1xf32, #tpu.memory_space<vmem>>, vector<1x1x128x1xf32>,
    } else {
    }
    return
  }
  func.func @transform_0(%arg0: i32, %arg1: i32, %arg2: i32) -> (i32, i32, i32) {
    %c0_i32 = arith.constant 0 : i32
    return %arg0, %arg2, %arg1 : i32, i32, i32
  }
  func.func @transform_1(%arg0: i32, %arg1: i32, %arg2: i32) -> (i32, i32, i32) {
    %c0_i32 = arith.constant 0 : i32
    %c0_i32_0 = arith.constant 0 : i32
    %c0_i32_1 = arith.constant 0 : i32
    %c0_i32_2 = arith.constant 0 : i32
    return %c0_i32, %c0_i32_0, %c0_i32_1 : i32, i32, i32
  }
  func.func @transform_2(%arg0: i32, %arg1: i32, %arg2: i32) -> (i32, i32, i32) {
    %c0_i32 = arith.constant 0 : i32
    %c0_i32_0 = arith.constant 0 : i32
    return %arg0, %c0_i32, %arg1 : i32, i32, i32
  }
  func.func @transform_3(%arg0: i32, %arg1: i32, %arg2: i32) -> (i32, i32, i32, i32) {
    %c0_i32 = arith.constant 0 : i32
    %c0_i32_0 = arith.constant 0 : i32
    %c0_i32_1 = arith.constant 0 : i32
    return %arg0, %arg1, %c0_i32, %c0_i32_0 : i32, i32, i32, i32
  }
  func.func @transform_4(%arg0: i32, %arg1: i32, %arg2: i32) -> (i32, i32, i32, i32) {
    %c0_i32 = arith.constant 0 : i32
    %c0_i32_0 = arith.constant 0 : i32
    %c0_i32_1 = arith.constant 0 : i32
    return %arg0, %arg1, %c0_i32, %c0_i32_0 : i32, i32, i32, i32
  }
}

</mosaic_0001>

<bundles_post_ra>
// kernel: tpu_custom_call.1
= control target key start
LH: loop header
LB: loop body
LE: loop exit
PB: predicated region body
PF: predicated region fallthrough
CT: control target
= control target key end

     0   :  { %10 = vsyncpa [#allocation3], 0  ;;  %s1804_s0 = inlined_call_operand.hbm [shape: f32[2,128,256], index: 0, kind: input, shape index: {}]   ;;  %s1805_s1 = inlined_call_operand.hbm [shape: f32[1,128,128], index: 1, kind: input, shape index: {}]   ;;  %s1806_s2 = inlined_call_operand.hbm [shape: f32[2,128,256], index: 2, kind: output, shape index: {0}]   ;;  %s1807_s3 = inlined_call_operand.vmem [shape: f32[2,1,128,1], index: 3, kind: output, shape index: {1}]   ;;  %s1808_s4 = inlined_call_operand.vmem [shape: f32[2,1,128,1], index: 4, kind: output, shape index: {2}]  }
   0x1   :  { %12 = vsyncpa [#allocation3 + $0x1], 0 }
   0x2   :  { %13 = vsyncpa [#allocation6], 0 }
   0x3   :  { %14 = vsyncpa [#allocation4], 0 }
   0x4   :  { %16 = vsyncpa [#allocation4 + $0x1], 0  ;;  %s1408_s15 = smov 0   ;;  %s1410_s16 = smov 0  }
   0x5   :  { %s1412_s17 = smov 0   ;;  %s1414_s18 = smov 0  }
   0x6   :  { %s1416_s19 = smov 0   ;;  %s1418_s20 = smov 0  }
   0x7 LB: > { %s1074_s21 = sadd.s32 4294967295, %s1371_s20   ;;  %s1075_s22 = sadd.s32 4294967294, %s1371_s20   ;;  %s1371_s20 = sphi %s1418_s20, %s22_s20   ;;  %s1367_s19 = sphi %s1416_s19, %s1832_s19   ;;  %s1363_s18 = sphi %s1414_s18, %s1831_s18   ;;  %s1359_s17 = sphi %s1412_s17, %s1830_s17   ;;  %s1355_s16 = sphi %s1410_s16, %s1829_s16   ;;  %s1351_s15 = sphi %s1408_s15, %s1828_s15  }
   0x8   : > { %p65_p0 = scmp.ne.s32.totalorder %s1355_s16, %s1351_s15  ;;  %p1442_p1 = scmp.eq.s32.totalorder %s1074_s21, 0 }
   0x9   : > { %p1446_p2 = scmp.eq.s32.totalorder %s1074_s21, 1  ;;  %p118_p3 = scmp.eq.s32.totalorder %s1075_s22, 1 }
   0xa   : > { %s1813_s23 = scalar_select %p1442_p1, 1, 0 }
   0xb   : > { %s1814_s24 = scalar_select %p1446_p2, 1, 0 }
   0xc   : > { %p1452_p4 = por %p1442_p1, %p65_p0  ;;  %p1076_p5 = scmp.ge.s32.totalorder %s1371_s20, 1 }
   0xd   : > { %p1457_p6 = por %p118_p3, %p65_p0  ;;  %p181_p7 = scmp.lt.s32.totalorder %s1371_s20, 3 }
   0xe   : > { %s1815_s25 = scalar_select %p1452_p4, 1, 0 }
   0xf   : > { %s1816_s26 = scalar_select %p1457_p6, 1, 0 }
  0x10   : > { %p1462_p8 = pnand %p1076_p5, %p181_p7  ;;  %s1373_s28 = smov [#allocation5]  }
  0x11   : > { %s193_s29 = sshll.u32 %s1373_s28, 4  ;;  %s41_s5 = sadd.s32 1, %s1367_s19  ;;  %s194_s29 = int_to_ptr.vmem [resolvable:$true] %s193_s29 }
  0x12   : > { %s1817_s27 = scalar_select %p1462_p8, 1, 0 }
  0x13   : > { %p1155_p9 = pneg %p1462_p8  ;;  %s1227_s8 = scalar_lea.hbm %s1805_s1, 2048 }
  0x14   : > { %p1228_p12 = scmp.ne.s32.totalorder %s1805_s1, %s1227_s8  ;;  %p1234_p5 = scmp.lt.u32.totalorder %s1227_s8, %s1805_s1 }
  0x15   : > { %p1471_p11 = pnand %p1155_p9, %p1442_p1 }
  0x17   : > { %p1229_p13 = pneg %p1471_p11 }
  0x19   : > { %p1230_p0 = pnand %p1229_p13, %p1228_p12 }
  0x1b   : > { %p1231_p3 = pneg %p1230_p0 }
  0x1d   : > { %p1236_p7 = pnand %p1234_p5, %p1231_p3 }
  0x1f   : > { %1239 = shalt.err (!%p1236_p7)
}
  0x20   : > { %s1240_s13 = scalar_lea.vmem %s194_s29, 2048  ;;  %p1248_p1 = scmp.lt.s32.totalorder %s194_s29, %s194_s29 }
  0x21   : > { %p1241_p9 = scmp.ne.s32.totalorder %s194_s29, %s1240_s13  ;;  %p1249_p4 = scmp.lt.s32.totalorder %s1240_s13, %s1240_s13 }
  0x23   : > { %p1243_p10 = pnand %p1241_p9, %p1229_p13  ;;  %p1250_p8 = por %p1249_p4, %p1248_p1 }
  0x25   : > { %p1244_p6 = pneg %p1243_p10 }
  0x27   : > { %p1251_p2 = pnand %p1250_p8, %p1244_p6 }
  0x29   : > { %1254 = shalt.err (!%p1251_p2)
}
  0x2a   : > { %s1374_s14 = smov 128   ;;  %s1375_s21 = smov 8  }
  0x2b   : > { %1158 = dma.hbm_to_vmem [thread:$0]  (!%p1471_p11), %s1805_s1, 2048, %s194_s29, [#allocation6], %s1374_s14, %s1374_s14, %s1375_s21  }
  0x2c   : > { %p43_p1 = scmp.ge.s32.totalorder %s41_s5, 2  ;;  %s52_s6 = sadd.s32 1, %s1359_s17 }
  0x2d   : > { %p59_p2 = scmp.ne.s32.totalorder %s1359_s17, %s1355_s16  ;;  %p60_p4 = scmp.eq.s32.totalorder %s1371_s20, 0 }
  0x2e   : > { %s1834_s5 = smov (%p43_p1, %s41_s5), 0  ;;  %p1820_p8 = scmp.ne.s32.totalorder %s1814_s24, 0 }
  0x2f   : > { %p1498_p6 = por %p60_p4, %p59_p2  ;;  %s45_s30 = ssub.s32 %s1367_s19, %s1834_s5 }
  0x30   : > { %p1504_p10 = por %p1820_p8, %p59_p2  ;;  %p1168_p12 = scmp.lt.s32.totalorder %s1371_s20, 2 }
  0x31   : > { %p50_p11 = scmp.eq.s32.totalorder %s45_s30, 0  ;;  %s207_s29 = sand.u32 1, %s1359_s17  }
  0x32   : > { %s1079_s9 = sshll.u32 %s207_s29, 8  ;;  %s1095_s11 = sshll.u32 %s1367_s19, 12 }
  0x33   : > { %s1513_s10 = scalar_select %p50_p11, %s1359_s17, %s52_s6  }
  0x34   : > { %s1519_s14 = scalar_lea.hbm %s1804_s0, %s1095_s11  ;;  %s211_s24 = scalar_lea.vmem [#allocation2], %s1079_s9 }
  0x35   : > { %s223_s21 = sshll.u32 %s211_s24, 4  ;;  %p1525_p13 = pnand %p1168_p12, %p1498_p6  ;;  %s1521_s21 = int_to_ptr.vmem [resolvable:$true] %s223_s21 }
  0x36   : > { %s1529_s28 = scalar_lea.sflag [#allocation3], %s207_s29  ;;  %s1255_s6 = scalar_lea.hbm %s1519_s14, 4096 }
  0x37   : > { %p1256_p0 = scmp.ne.s32.totalorder %s1519_s14, %s1255_s6  ;;  %p1257_p3 = pneg %p1525_p13 }
  0x38   : > { %s1260_s7 = scalar_lea.hbm %s1804_s0, 8192  ;;  %p1261_p9 = scmp.lt.u32.totalorder %s1519_s14, %s1804_s0 }
  0x39   : > { %p1258_p5 = pnand %p1257_p3, %p1256_p0  ;;  %p1262_p1 = scmp.lt.u32.totalorder %s1260_s7, %s1255_s6 }
  0x3a   : > { %p1264_p4 = scmp.lt.u32.totalorder %s1255_s6, %s1519_s14 }
  0x3b   : > { %p1259_p7 = pneg %p1258_p5  ;;  %p1263_p2 = por %p1262_p1, %p1261_p9 }
  0x3d   : > { %p1265_p6 = por %p1264_p4, %p1263_p2 }
  0x3f   : > { %p1266_p8 = pnand %p1265_p6, %p1259_p7 }
  0x41   : > { %1269 = shalt.err (!%p1266_p8)
}
  0x42   : > { %s1270_s29 = scalar_lea.vmem %s1521_s21, 4096  ;;  %s1376_s13 = smov [#allocation2]  }
  0x43   : > { %p1271_p12 = scmp.ne.s32.totalorder %s1521_s21, %s1270_s29  ;;  %s1275_s24 = sshll.u32 %s1376_s13, 4  ;;  %s1276_s24 = int_to_ptr.vmem [resolvable:$false] %s1275_s24 }
  0x44   : > { %s1277_s30 = scalar_lea.vmem %s1276_s24, 8192  ;;  %p1278_p5 = scmp.lt.s32.totalorder %s1521_s21, %s1276_s24 }
  0x45   : > { %p1273_p11 = pnand %p1271_p12, %p1257_p3  ;;  %p1279_p9 = scmp.lt.s32.totalorder %s1277_s30, %s1270_s29 }
  0x47   : > { %p1274_p0 = pneg %p1273_p11  ;;  %p1280_p1 = por %p1279_p9, %p1278_p5 }
  0x49   : > { %p1281_p2 = pnand %p1280_p1, %p1274_p0 }
  0x4b   : > { %1284 = shalt.err (!%p1281_p2)
}
  0x4c   : > { %s1377_s6 = smov 256   ;;  %s1378_s9 = smov 16  }
  0x4d   : > { %1162 = dma.hbm_to_vmem [thread:$0]  (!%p1525_p13), %s1519_s14, 4096, %s1521_s21, %s1529_s28, %s1377_s6, %s1377_s6, %s1378_s9  }
  0x4e   : > { %p1823_p3 = scmp.ne.s32.totalorder %s1817_s27, 0 }
  0x4f   : > { %s1560_s7 = sand.u32 (!%p1823_p3), 1, %s1355_s16   ;;  %p1824_p7 = scmp.ne.s32.totalorder (!%p1823_p3), %s1815_s25, 0 }
  0x50   : > { %235 = sbr.rel (%p1823_p3) target bundleno = 548 (0x224), region = 28  ;;  %s1083_s11 = sshll.u32 (!%p1823_p3), %s1560_s7, 8 }
  0x51   : > { %s238_s12 = scalar_lea.sflag (!%p1823_p3), [#allocation3], %s1560_s7  ;;  %s1566_s29 = scalar_lea.vmem (!%p1823_p3), [#allocation2], %s1083_s11 }
  0x57   : > { %1338 = dma.done.wait (%p1824_p7), %s238_s12, 4096  }
  0x58   : > { %1340 = vsyncadd (%p1824_p7), %s238_s12, 4294963200  ;;  %p1825_p13 = scmp.ne.s32.totalorder %s1813_s23, 0 }
  0x5a   : > { %1342 = dma.done.wait (%p1825_p13), [#allocation6], 2048  }
  0x5b   : > { %1344 = vsyncadd (%p1825_p13), [#allocation6], 4294965248  ;;  %v1379_v0 = vmov 0.0   ;;  %v396_v1 = vld [vmem:[%s1566_s29 + $0x8] sm:$0xff]  ;;  %v398_v2 = vld [vmem:[%s1566_s29 + $0x18] sm:$0xff]  ;;  %s1626_s23 = scalar_lea.vmem [#allocation7], %s1083_s11 }
  0x5c   : > { %491 = vmatprep.mubr.f32.mxu0 %v1379_v0  ;;  %539 = vmatprep.mubr.f32.mxu1 %v1379_v0  ;;  %v395_v3 = vld [vmem:[%s1566_s29] sm:$0xff]  ;;  %v1099_v4 = vpack.c.bf16 %v398_v2, %v396_v1  ;;  %v397_v5 = vld [vmem:[%s1566_s29 + $0x10] sm:$0xff]  ;;  %v400_v6 = vld [vmem:[%s1566_s29 + $0x28] sm:$0xff]  ;;  %s1098_s25 = sshll.u32 %s1363_s18, 12  ;;  %s882_s27 = sshll.u32 %s1626_s23, 4  ;;  %s1679_s27 = int_to_ptr.vmem [resolvable:$true] %s882_s27 }
  0x5d   : > { %v402_v7 = vld [vmem:[%s1566_s29 + $0x38] sm:$0xff]  ;;  %v1101_v8 = vpack.c.bf16 %v397_v5, %v395_v3  ;;  %v399_v10 = vld [vmem:[%s1566_s29 + $0x20] sm:$0xff]  ;;  %v401_v11 = vld [vmem:[%s1566_s29 + $0x30] sm:$0xff]  ;;  %s1677_s22 = scalar_lea.hbm %s1806_s2, %s1098_s25  ;;  %s849_s28 = scalar_lea.sflag [#allocation4], %s1560_s7 }
  0x5e   : > { %v1103_v9 = vpack.c.bf16 %v402_v7, %v400_v6  ;;  %v404_v12 = vld [vmem:[%s1566_s29 + $0x48] sm:$0xff]  ;;  %1100 = vmatprep.subr.bf16.mxu0 %v1099_v4  ;;  %1131 = vmatprep.subr.bf16.mxu1 %v1099_v4  ;;  %v406_v13 = vld [vmem:[%s1566_s29 + $0x58] sm:$0xff]  ;;  %v1105_v14 = vpack.c.bf16 %v401_v11, %v399_v10  ;;  %v403_v16 = vld [vmem:[%s1566_s29 + $0x40] sm:$0xff]  ;;  %s1285_s13 = scalar_lea.vmem %s1679_s27, 4096  ;;  %s1380_s24 = smov [#allocation7]  }
  0x5f   : > { %1102 = vmatpush1.bf16.msra.mxu0 %v1101_v8  ;;  %1139 = vmatpush1.bf16.msra.mxu1 %v1101_v8  ;;  %v1107_v15 = vpack.c.bf16 %v406_v13, %v404_v12  ;;  %v405_v17 = vld [vmem:[%s1566_s29 + $0x50] sm:$0xff]  ;;  %v408_v18 = vld [vmem:[%s1566_s29 + $0x68] sm:$0xff]  ;;  %v410_v19 = vld [vmem:[%s1566_s29 + $0x78] sm:$0xff]  ;;  %p1286_p4 = scmp.ne.s32.totalorder %s1679_s27, %s1285_s13  ;;  %s1289_s30 = sshll.u32 %s1380_s24, 4  ;;  %s1290_s30 = int_to_ptr.vmem [resolvable:$false] %s1289_s30 }
  0x60   : > { %1104 = vmatprep.subr.bf16.mxu0 %v1103_v9  ;;  %1132 = vmatprep.subr.bf16.mxu1 %v1103_v9  ;;  %v1109_v20 = vpack.c.bf16 %v405_v17, %v403_v16  ;;  %v1111_v21 = vpack.c.bf16 %v410_v19, %v408_v18  ;;  %v407_v22 = vld [vmem:[%s1566_s29 + $0x60] sm:$0xff]  ;;  %v409_v23 = vld [vmem:[%s1566_s29 + $0x70] sm:$0xff]  ;;  %v412_v24 = vld [vmem:[%s1566_s29 + $0x88] sm:$0xff]  ;;  %s1291_s6 = scalar_lea.vmem %s1290_s30, 8192  ;;  %p1292_p12 = scmp.lt.s32.totalorder %s1679_s27, %s1290_s30 }
  0x61   : > { %v414_v25 = vld [vmem:[%s1566_s29 + $0x98] sm:$0xff]  ;;  %v1113_v26 = vpack.c.bf16 %v409_v23, %v407_v22  ;;  %v411_v28 = vld [vmem:[%s1566_s29 + $0x80] sm:$0xff]  ;;  %v413_v29 = vld [vmem:[%s1566_s29 + $0x90] sm:$0xff]  ;;  %p1287_p6 = pnand %p1286_p4, %p1504_p10  ;;  %p1293_p11 = scmp.lt.s32.totalorder %s1291_s6, %s1285_s13 }
  0x62   : > { %v1115_v27 = vpack.c.bf16 %v414_v25, %v412_v24  ;;  %v416_v30 = vld [vmem:[%s1566_s29 + $0xa8] sm:$0xff]  ;;  %v418_v31 = vld [vmem:[%s1566_s29 + $0xb8] sm:$0xff]  ;;  %v1117_v32 = vpack.c.bf16 %v413_v29, %v411_v28  ;;  %v415_v34 = vld [vmem:[%s1566_s29 + $0xa0] sm:$0xff] }
  0x63   : > { %1106 = vmatpush1.bf16.msra.mxu0 %v1105_v14  ;;  %1140 = vmatpush1.bf16.msra.mxu1 %v1105_v14  ;;  %v1119_v33 = vpack.c.bf16 %v418_v31, %v416_v30  ;;  %v417_v35 = vld [vmem:[%s1566_s29 + $0xb0] sm:$0xff]  ;;  %v420_v36 = vld [vmem:[%s1566_s29 + $0xc8] sm:$0xff]  ;;  %v422_v37 = vld [vmem:[%s1566_s29 + $0xd8] sm:$0xff]  ;;  %p1288_p8 = pneg %p1287_p6  ;;  %p1294_p0 = por %p1293_p11, %p1292_p12 }
  0x64   : > { %1108 = vmatprep.subr.bf16.mxu0 %v1107_v15  ;;  %1133 = vmatprep.subr.bf16.mxu1 %v1107_v15  ;;  %v1121_v38 = vpack.c.bf16 %v417_v35, %v415_v34  ;;  %v1123_v39 = vpack.c.bf16 %v422_v37, %v420_v36  ;;  %v419_v40 = vld [vmem:[%s1566_s29 + $0xc0] sm:$0xff]  ;;  %v421_v41 = vld [vmem:[%s1566_s29 + $0xd0] sm:$0xff]  ;;  %v424_v42 = vld [vmem:[%s1566_s29 + $0xe8] sm:$0xff] }
  0x65   : > { %v426_v43 = vld [vmem:[%s1566_s29 + $0xf8] sm:$0xff]  ;;  %v1125_v44 = vpack.c.bf16 %v421_v41, %v419_v40  ;;  %v423_v46 = vld [vmem:[%s1566_s29 + $0xe0] sm:$0xff]  ;;  %v425_v47 = vld [vmem:[%s1566_s29 + $0xf0] sm:$0xff]  ;;  %p1295_p5 = pnand %p1294_p0, %p1288_p8 }
  0x66   : > { %v1127_v45 = vpack.c.bf16 %v426_v43, %v424_v42  ;;  %v1129_v48 = vpack.c.bf16 %v425_v47, %v423_v46  ;;  %v379_v49 = vld [vmem:[#allocation5] sm:$0xff]  ;;  %v388_v51 = vld [vmem:[#allocation5 + $0x48] sm:$0xff]  ;;  %v381_v53 = vld [vmem:[#allocation5 + $0x10] sm:$0xff] }
  0x67   : > { %1110 = vmatpush1.bf16.msra.mxu0 %v1109_v20  ;;  %1141 = vmatpush1.bf16.msra.mxu1 %v1109_v20  ;;  %v387_v50 = vld [vmem:[#allocation5 + $0x40] sm:$0xff]  ;;  %v380_v52 = vld [vmem:[#allocation5 + $0x8] sm:$0xff]  ;;  %v389_v54 = vld [vmem:[#allocation5 + $0x50] sm:$0xff] }
  0x68   : > { %1112 = vmatprep.subr.bf16.mxu0 %v1111_v21  ;;  %1134 = vmatprep.subr.bf16.mxu1 %v1111_v21  ;;  %v382_v55 = vld [vmem:[#allocation5 + $0x18] sm:$0xff]  ;;  %v383_v57 = vld [vmem:[#allocation5 + $0x20] sm:$0xff]  ;;  %v384_v59 = vld [vmem:[#allocation5 + $0x28] sm:$0xff] }
  0x69   : > { %v390_v56 = vld [vmem:[#allocation5 + $0x58] sm:$0xff]  ;;  %v391_v58 = vld [vmem:[#allocation5 + $0x60] sm:$0xff]  ;;  %v392_v60 = vld [vmem:[#allocation5 + $0x68] sm:$0xff] }
  0x6a   : > { %v385_v61 = vld [vmem:[#allocation5 + $0x30] sm:$0xff]  ;;  %v386_v63 = vld [vmem:[#allocation5 + $0x38] sm:$0xff] }
  0x6b   : > { %1114 = vmatpush1.bf16.msra.mxu0 %v1113_v26  ;;  %1142 = vmatpush1.bf16.msra.mxu1 %v1113_v26  ;;  %v393_v62 = vld [vmem:[#allocation5 + $0x70] sm:$0xff]  ;;  %v394_v1 = vld [vmem:[#allocation5 + $0x78] sm:$0xff] }
  0x6c   : > { %1116 = vmatprep.subr.bf16.mxu0 %v1115_v27  ;;  %1135 = vmatprep.subr.bf16.mxu1 %v1115_v27 }
  0x6f   : > { %1118 = vmatpush1.bf16.msra.mxu0 %v1117_v32  ;;  %1143 = vmatpush1.bf16.msra.mxu1 %v1117_v32 }
  0x70   : > { %1120 = vmatprep.subr.bf16.mxu0 %v1119_v33  ;;  %1136 = vmatprep.subr.bf16.mxu1 %v1119_v33 }
  0x73   : > { %1122 = vmatpush1.bf16.msra.mxu0 %v1121_v38  ;;  %1144 = vmatpush1.bf16.msra.mxu1 %v1121_v38 }
  0x74   : > { %1124 = vmatprep.subr.bf16.mxu0 %v1123_v39  ;;  %1137 = vmatprep.subr.bf16.mxu1 %v1123_v39 }
  0x77   : > { %1126 = vmatpush1.bf16.msra.mxu0 %v1125_v44  ;;  %1145 = vmatpush1.bf16.msra.mxu1 %v1125_v44 }
  0x78   : > { %1128 = vmatprep.subr.bf16.mxu0 %v1127_v45  ;;  %1138 = vmatprep.subr.bf16.mxu1 %v1127_v45 }
  0x7b   : > { %1130 = vmatpush1.bf16.msra.mxu0 %v1129_v48  ;;  %1146 = vmatpush1.bf16.msra.mxu1 %v1129_v48 }
  0x7e   : > { %492 = vmatmul.mubr.f32.vlgmr.msra.gmra.mrb[0].mxu0 %v379_v49  ;;  %540 = vmatmul.mubr.f32.vlgmr.msra.gmra.mrb[0].mxu1 %v387_v50 }
  0x7f   : > { %545 = vmatprep.mubr.f32.mxu1 %v1379_v0  ;;  %497 = vmatprep.mubr.f32.mxu0 %v1379_v0 }
  0x82   : > { %546 = vmatmul.mubr.f32.gmra.mrb[2].mxu1 %v388_v51  ;;  %498 = vmatmul.mubr.f32.gmra.mrb[2].mxu0 %v380_v52 }
  0x83   : > { %503 = vmatprep.mubr.f32.mxu0 %v1379_v0  ;;  %551 = vmatprep.mubr.f32.mxu1 %v1379_v0 }
  0x86   : > { %504 = vmatmul.mubr.f32.gmra.mrb[4].mxu0 %v381_v53  ;;  %552 = vmatmul.mubr.f32.gmra.mrb[4].mxu1 %v389_v54 }
  0x87   : > { %509 = vmatprep.mubr.f32.mxu0 %v1379_v0  ;;  %557 = vmatprep.mubr.f32.mxu1 %v1379_v0 }
  0x8a   : > { %510 = vmatmul.mubr.f32.gmra.mrb[6].mxu0 %v382_v55  ;;  %558 = vmatmul.mubr.f32.gmra.mrb[6].mxu1 %v390_v56 }
  0x8b   : > { %515 = vmatprep.mubr.f32.mxu0 %v1379_v0  ;;  %563 = vmatprep.mubr.f32.mxu1 %v1379_v0 }
  0x8e   : > { %516 = vmatmul.mubr.f32.gmra.mrb[8].mxu0 %v383_v57  ;;  %564 = vmatmul.mubr.f32.gmra.mrb[8].mxu1 %v391_v58 }
  0x8f   : > { %521 = vmatprep.mubr.f32.mxu0 %v1379_v0  ;;  %569 = vmatprep.mubr.f32.mxu1 %v1379_v0 }
  0x92   : > { %522 = vmatmul.mubr.f32.gmra.mrb[10].mxu0 %v384_v59  ;;  %570 = vmatmul.mubr.f32.gmra.mrb[10].mxu1 %v392_v60 }
  0x93   : > { %527 = vmatprep.mubr.f32.mxu0 %v1379_v0  ;;  %575 = vmatprep.mubr.f32.mxu1 %v1379_v0 }
  0x96   : > { %528 = vmatmul.mubr.f32.gmra.mrb[12].mxu0 %v385_v61  ;;  %576 = vmatmul.mubr.f32.gmra.mrb[12].mxu1 %v393_v62 }
  0x97   : > { %533 = vmatprep.mubr.f32.mxu0 %v1379_v0  ;;  %581 = vmatprep.mubr.f32.mxu1 %v1379_v0 }
  0x9a   : > { %534 = vmatmul.mubr.f32.gmra.mrb[14].mxu0 %v386_v63  ;;  %582 = vmatmul.mubr.f32.gmra.mrb[14].mxu1 %v394_v1 }
 0x151   : > { %v493_v2 = vpop.f32.mrb[0].mxu0  ;;  %v541_v3 = vpop.f32.mrb[0].mxu1 }
 0x152   : > { %v495_v4 = vpop.f32.mrb[1].mxu0  ;;  %v543_v5 = vpop.f32.mrb[1].mxu1  ;;  %620 = vst [vmem:[%s1626_s23] sm:$0xff] %v493_v2  ;;  %636 = vst [vmem:[%s1626_s23 + $0x80] sm:$0xff] %v541_v3  ;;  %v752_v6 = vmul.f32 %v493_v2, %v493_v2  ;;  %v768_v0 = vmul.f32 %v541_v3, %v541_v3 }
 0x153   : > { %621 = vst [vmem:[%s1626_s23 + $0x8] sm:$0xff] %v495_v4  ;;  %637 = vst [vmem:[%s1626_s23 + $0x88] sm:$0xff] %v543_v5  ;;  %v687_v9 = vadd.f32 %v495_v4, %v493_v2  ;;  %v753_v10 = vmul.f32 %v495_v4, %v495_v4  ;;  %v711_v11 = vadd.f32 %v543_v5, %v541_v3 }
 0x154   : > { %v769_v12 = vmul.f32 %v543_v5, %v543_v5 }
 0x155   : > { %v547_v7 = vpop.f32.mrb[2].mxu1  ;;  %v499_v8 = vpop.f32.mrb[2].mxu0  ;;  %688 = vadd.xlane.f32.xlu0 %v687_v9  ;;  %v784_v15 = vadd.f32 %v753_v10, %v752_v6 }
 0x156   : > { %v549_v13 = vpop.f32.mrb[3].mxu1  ;;  %v501_v14 = vpop.f32.mrb[3].mxu0  ;;  %v808_v16 = vadd.f32 %v769_v12, %v768_v0  ;;  %638 = vst [vmem:[%s1626_s23 + $0x90] sm:$0xff] %v547_v7  ;;  %622 = vst [vmem:[%s1626_s23 + $0x10] sm:$0xff] %v499_v8  ;;  %v770_v17 = vmul.f32 %v547_v7, %v547_v7  ;;  %v754_v18 = vmul.f32 %v499_v8, %v499_v8 }
 0x157   : > { %639 = vst [vmem:[%s1626_s23 + $0x98] sm:$0xff] %v549_v13  ;;  %623 = vst [vmem:[%s1626_s23 + $0x18] sm:$0xff] %v501_v14  ;;  %v714_v20 = vadd.f32 %v549_v13, %v547_v7  ;;  %v771_v21 = vmul.f32 %v549_v13, %v549_v13  ;;  %v755_v23 = vmul.f32 %v501_v14, %v501_v14 }
 0x158   : > { %v690_v24 = vadd.f32 %v501_v14, %v499_v8 }
 0x159   : > { %v505_v19 = vpop.f32.mrb[4].mxu0  ;;  %v553_v22 = vpop.f32.mrb[4].mxu1  ;;  %715 = vadd.xlane.f32.xlu1 %v714_v20  ;;  %712 = vadd.xlane.f32.xlu0 %v711_v11  ;;  %v787_v27 = vadd.f32 %v755_v23, %v754_v18  ;;  %v811_v28 = vadd.f32 %v771_v21, %v770_v17 }
 0x15a   : > { %v507_v25 = vpop.f32.mrb[5].mxu0  ;;  %v555_v26 = vpop.f32.mrb[5].mxu1  ;;  %624 = vst [vmem:[%s1626_s23 + $0x20] sm:$0xff] %v505_v19  ;;  %640 = vst [vmem:[%s1626_s23 + $0xa0] sm:$0xff] %v553_v22  ;;  %v756_v29 = vmul.f32 %v505_v19, %v505_v19  ;;  %v772_v30 = vmul.f32 %v553_v22, %v553_v22 }
 0x15b   : > { %625 = vst [vmem:[%s1626_s23 + $0x28] sm:$0xff] %v507_v25  ;;  %641 = vst [vmem:[%s1626_s23 + $0xa8] sm:$0xff] %v555_v26  ;;  %v693_v33 = vadd.f32 %v507_v25, %v505_v19  ;;  %v717_v34 = vadd.f32 %v555_v26, %v553_v22  ;;  %v757_v35 = vmul.f32 %v507_v25, %v507_v25 }
 0x15c   : > { %v773_v36 = vmul.f32 %v555_v26, %v555_v26 }
 0x15d   : > { %v511_v31 = vpop.f32.mrb[6].mxu0  ;;  %v559_v32 = vpop.f32.mrb[6].mxu1  ;;  %788 = vadd.xlane.f32.xlu1 %v787_v27  ;;  %785 = vadd.xlane.f32.xlu0 %v784_v15  ;;  %v1640_v39 = vadd.f32 %v757_v35, %v756_v29 }
 0x15e   : > { %v513_v37 = vpop.f32.mrb[7].mxu0  ;;  %v561_v38 = vpop.f32.mrb[7].mxu1  ;;  %626 = vst [vmem:[%s1626_s23 + $0x30] sm:$0xff] %v511_v31  ;;  %642 = vst [vmem:[%s1626_s23 + $0xb0] sm:$0xff] %v559_v32  ;;  %v758_v40 = vmul.f32 %v511_v31, %v511_v31  ;;  %v1644_v41 = vadd.f32 %v773_v36, %v772_v30  ;;  %v774_v42 = vmul.f32 %v559_v32, %v559_v32 }
 0x15f   : > { %627 = vst [vmem:[%s1626_s23 + $0x38] sm:$0xff] %v513_v37  ;;  %643 = vst [vmem:[%s1626_s23 + $0xb8] sm:$0xff] %v561_v38  ;;  %v696_v44 = vadd.f32 %v513_v37, %v511_v31  ;;  %v720_v46 = vadd.f32 %v561_v38, %v559_v32  ;;  %v759_v47 = vmul.f32 %v513_v37, %v513_v37 }
 0x160   : > { %v775_v48 = vmul.f32 %v561_v38, %v561_v38 }
 0x161   : > { %v517_v43 = vpop.f32.mrb[8].mxu0  ;;  %v565_v45 = vpop.f32.mrb[8].mxu1  ;;  %812 = vadd.xlane.f32.xlu1 %v811_v28  ;;  %809 = vadd.xlane.f32.xlu0 %v808_v16  ;;  %v1648_v51 = vadd.f32 %v759_v47, %v758_v40 }
 0x162   : > { %v519_v49 = vpop.f32.mrb[9].mxu0  ;;  %v567_v50 = vpop.f32.mrb[9].mxu1  ;;  %628 = vst [vmem:[%s1626_s23 + $0x40] sm:$0xff] %v517_v43  ;;  %644 = vst [vmem:[%s1626_s23 + $0xc0] sm:$0xff] %v565_v45  ;;  %v1652_v52 = vadd.f32 %v775_v48, %v774_v42  ;;  %v760_v53 = vmul.f32 %v517_v43, %v517_v43  ;;  %v776_v54 = vmul.f32 %v565_v45, %v565_v45 }
 0x163   : > { %629 = vst [vmem:[%s1626_s23 + $0x48] sm:$0xff] %v519_v49  ;;  %645 = vst [vmem:[%s1626_s23 + $0xc8] sm:$0xff] %v567_v50  ;;  %v699_v57 = vadd.f32 %v519_v49, %v517_v43  ;;  %v723_v58 = vadd.f32 %v567_v50, %v565_v45  ;;  %v761_v59 = vmul.f32 %v519_v49, %v519_v49 }
 0x164   : > { %v777_v60 = vmul.f32 %v567_v50, %v567_v50 }
 0x165   : > { %v523_v55 = vpop.f32.mrb[10].mxu0  ;;  %v571_v56 = vpop.f32.mrb[10].mxu1  ;;  %694 = vadd.xlane.f32.xlu1 %v693_v33  ;;  %691 = vadd.xlane.f32.xlu0 %v690_v24  ;;  %v796_v63 = vadd.f32 %v761_v59, %v760_v53 }
 0x166   : > { %v525_v61 = vpop.f32.mrb[11].mxu0  ;;  %v573_v62 = vpop.f32.mrb[11].mxu1  ;;  %630 = vst [vmem:[%s1626_s23 + $0x50] sm:$0xff] %v523_v55  ;;  %646 = vst [vmem:[%s1626_s23 + $0xd0] sm:$0xff] %v571_v56  ;;  %v762_v1 = vmul.f32 %v523_v55, %v523_v55  ;;  %v820_v2 = vadd.f32 %v777_v60, %v776_v54  ;;  %v778_v3 = vmul.f32 %v571_v56, %v571_v56 }
 0x167   : > { %631 = vst [vmem:[%s1626_s23 + $0x58] sm:$0xff] %v525_v61  ;;  %647 = vst [vmem:[%s1626_s23 + $0xd8] sm:$0xff] %v573_v62  ;;  %v702_v5 = vadd.f32 %v525_v61, %v523_v55  ;;  %v726_v0 = vadd.f32 %v573_v62, %v571_v56  ;;  %v763_v7 = vmul.f32 %v525_v61, %v525_v61 }
 0x168   : > { %v779_v8 = vmul.f32 %v573_v62, %v573_v62 }
 0x169   : > { %v529_v4 = vpop.f32.mrb[12].mxu0  ;;  %v577_v6 = vpop.f32.mrb[12].mxu1  ;;  %697 = vadd.xlane.f32.xlu1 %v696_v44  ;;  %718 = vadd.xlane.f32.xlu0 %v717_v34  ;;  %v799_v11 = vadd.f32 %v763_v7, %v762_v1 }
 0x16a   : > { %v531_v9 = vpop.f32.mrb[13].mxu0  ;;  %v579_v10 = vpop.f32.mrb[13].mxu1  ;;  %632 = vst [vmem:[%s1626_s23 + $0x60] sm:$0xff] %v529_v4  ;;  %648 = vst [vmem:[%s1626_s23 + $0xe0] sm:$0xff] %v577_v6  ;;  %v823_v12 = vadd.f32 %v779_v8, %v778_v3  ;;  %v764_v13 = vmul.f32 %v529_v4, %v529_v4  ;;  %v780_v14 = vmul.f32 %v577_v6, %v577_v6 }
 0x16b   : > { %633 = vst [vmem:[%s1626_s23 + $0x68] sm:$0xff] %v531_v9  ;;  %649 = vst [vmem:[%s1626_s23 + $0xe8] sm:$0xff] %v579_v10  ;;  %v705_v17 = vadd.f32 %v531_v9, %v529_v4  ;;  %v729_v18 = vadd.f32 %v579_v10, %v577_v6  ;;  %v765_v19 = vmul.f32 %v531_v9, %v531_v9 }
 0x16c   : > { %v781_v20 = vmul.f32 %v579_v10, %v579_v10 }
 0x16d   : > { %v535_v15 = vpop.f32.mrb[14].mxu0  ;;  %v583_v16 = vpop.f32.mrb[14].mxu1  ;;  %721 = vadd.xlane.f32.xlu1 %v720_v46  ;;  %791 = vadd.xlane.f32.xlu0 %v1640_v39  ;;  %v802_v23 = vadd.f32 %v765_v19, %v764_v13 }
 0x16e   : > { %v537_v21 = vpop.f32.mrb[15].mxu0  ;;  %v585_v22 = vpop.f32.mrb[15].mxu1  ;;  %634 = vst [vmem:[%s1626_s23 + $0x70] sm:$0xff] %v535_v15  ;;  %650 = vst [vmem:[%s1626_s23 + $0xf0] sm:$0xff] %v583_v16  ;;  %v766_v24 = vmul.f32 %v535_v15, %v535_v15  ;;  %v826_v25 = vadd.f32 %v781_v20, %v780_v14  ;;  %v782_v26 = vmul.f32 %v583_v16, %v583_v16 }
 0x16f   : > { %635 = vst [vmem:[%s1626_s23 + $0x78] sm:$0xff] %v537_v21  ;;  %651 = vst [vmem:[%s1626_s23 + $0xf8] sm:$0xff] %v585_v22  ;;  %v708_v27 = vadd.f32 %v537_v21, %v535_v15  ;;  %v732_v28 = vadd.f32 %v585_v22, %v583_v16  ;;  %v767_v29 = vmul.f32 %v537_v21, %v537_v21 }
 0x170   : > { %v783_v30 = vmul.f32 %v585_v22, %v585_v22 }
 0x171   : > { %794 = vadd.xlane.f32.xlu1 %v1648_v51  ;;  %815 = vadd.xlane.f32.xlu0 %v1644_v41  ;;  %v805_v31 = vadd.f32 %v767_v29, %v766_v24 }
 0x172   : > { %v829_v32 = vadd.f32 %v783_v30, %v782_v26 }
 0x175   : > { %818 = vadd.xlane.f32.xlu1 %v1652_v52  ;;  %700 = vadd.xlane.f32.xlu0 %v699_v57 }
 0x179   : > { %703 = vadd.xlane.f32.xlu1 %v702_v5  ;;  %724 = vadd.xlane.f32.xlu0 %v723_v58 }
 0x17d   : > { %727 = vadd.xlane.f32.xlu1 %v726_v0  ;;  %797 = vadd.xlane.f32.xlu0 %v796_v63 }
 0x181   : > { %800 = vadd.xlane.f32.xlu1 %v799_v11  ;;  %821 = vadd.xlane.f32.xlu0 %v820_v2 }
 0x185   : > { %824 = vadd.xlane.f32.xlu1 %v823_v12  ;;  %706 = vadd.xlane.f32.xlu0 %v705_v17 }
 0x189   : > { %709 = vadd.xlane.f32.xlu1 %v708_v27  ;;  %730 = vadd.xlane.f32.xlu0 %v729_v18 }
 0x18d   : > { %733 = vadd.xlane.f32.xlu1 %v732_v28  ;;  %803 = vadd.xlane.f32.xlu0 %v802_v23 }
 0x191   : > { %806 = vadd.xlane.f32.xlu1 %v805_v31  ;;  %827 = vadd.xlane.f32.xlu0 %v826_v25 }
 0x195   : > { %830 = vadd.xlane.f32.xlu1 %v829_v32 }
 0x196   : > { %1298 = shalt.err (!%p1295_p5)
}
 0x197   : > { %s1299_s9 = scalar_lea.hbm %s1677_s22, 4096  ;;  %s1303_s29 = scalar_lea.hbm %s1806_s2, 8192 }
 0x198   : > { %p1300_p9 = scmp.ne.s32.totalorder %s1677_s22, %s1299_s9  ;;  %p1304_p3 = scmp.lt.u32.totalorder %s1677_s22, %s1806_s2 }
 0x199   : > { %p1305_p7 = scmp.lt.u32.totalorder %s1303_s29, %s1299_s9  ;;  %p1307_p4 = scmp.lt.u32.totalorder %s1299_s9, %s1677_s22 }
 0x19a   : > { %p1301_p1 = pnand %p1300_p9, %p1504_p10 }
 0x19b   : > { %p1306_p13 = por %p1305_p7, %p1304_p3 }
 0x19c   : > { %p1302_p2 = pneg %p1301_p1 }
 0x19d   : > { %p1308_p6 = por %p1307_p4, %p1306_p13 }
 0x19f   : > { %p1309_p8 = pnand %p1308_p6, %p1302_p2 }
 0x1a1   : > { %1312 = shalt.err (!%p1309_p8)
}
 0x1a2   : > { %s1381_s14 = smov 256   ;;  %s1382_s21 = smov 16   ;;  %vm735_vm0 = vcmask 7168  }
 0x1a3   : > { %1153 = dma.vmem_to_hbm [thread:$0]  (%p1504_p10), %s1679_s27, 4096, %s1677_s22, %s849_s28, %s1381_s14, %s1381_s14, %s1382_s21  }
 0x1a4   : > { %p291_p12 = scmp.lt.s32.totalorder %s1363_s18, 1 }
 0x1a6   : > { %s1836_s18 = smov (!%p291_p12, %s1363_s18), 1 }
 0x1a7   : > { %s1096_s13 = sshll.u32 %s1836_s18, 7 }
 0x1a8   : > { %s1710_s6 = scalar_lea.vmem %s1807_s3, %s1096_s13  ;;  %s1721_s7 = scalar_lea.vmem %s1808_s4, %s1096_s13 }
 0x1e2   : > { %v689_v33 = vpop.xlane.xlu0 %688 }
 0x1e3   : > { %736 = vst.msk [vmem:[%s1710_s6] sm:$0xff] %vm735_vm0, %v689_v33 }
 0x1e6   : > { %v716_v34 = vpop.xlane.xlu1 %715  ;;  %v713_v35 = vpop.xlane.xlu0 %712 }
 0x1e7   : > { %745 = vst.msk [vmem:[%s1710_s6 + $0x48] sm:$0xff] %vm735_vm0, %v716_v34  ;;  %744 = vst.msk [vmem:[%s1710_s6 + $0x40] sm:$0xff] %vm735_vm0, %v713_v35 }
 0x1ea   : > { %v789_v36 = vpop.xlane.xlu1 %788  ;;  %v786_v37 = vpop.xlane.xlu0 %785 }
 0x1eb   : > { %833 = vst.msk [vmem:[%s1721_s7 + $0x8] sm:$0xff] %vm735_vm0, %v789_v36  ;;  %832 = vst.msk [vmem:[%s1721_s7] sm:$0xff] %vm735_vm0, %v786_v37 }
 0x1ee   : > { %v813_v38 = vpop.xlane.xlu1 %812  ;;  %v810_v39 = vpop.xlane.xlu0 %809 }
 0x1ef   : > { %841 = vst.msk [vmem:[%s1721_s7 + $0x48] sm:$0xff] %vm735_vm0, %v813_v38  ;;  %840 = vst.msk [vmem:[%s1721_s7 + $0x40] sm:$0xff] %vm735_vm0, %v810_v39 }
 0x1f2   : > { %v695_v40 = vpop.xlane.xlu1 %694  ;;  %v692_v41 = vpop.xlane.xlu0 %691 }
 0x1f3   : > { %738 = vst.msk [vmem:[%s1710_s6 + $0x10] sm:$0xff] %vm735_vm0, %v695_v40  ;;  %737 = vst.msk [vmem:[%s1710_s6 + $0x8] sm:$0xff] %vm735_vm0, %v692_v41 }
 0x1f6   : > { %v698_v42 = vpop.xlane.xlu1 %697  ;;  %v719_v43 = vpop.xlane.xlu0 %718 }
 0x1f7   : > { %739 = vst.msk [vmem:[%s1710_s6 + $0x18] sm:$0xff] %vm735_vm0, %v698_v42  ;;  %746 = vst.msk [vmem:[%s1710_s6 + $0x50] sm:$0xff] %vm735_vm0, %v719_v43 }
 0x1fa   : > { %v722_v44 = vpop.xlane.xlu1 %721  ;;  %v792_v45 = vpop.xlane.xlu0 %791 }
 0x1fb   : > { %747 = vst.msk [vmem:[%s1710_s6 + $0x58] sm:$0xff] %vm735_vm0, %v722_v44  ;;  %834 = vst.msk [vmem:[%s1721_s7 + $0x10] sm:$0xff] %vm735_vm0, %v792_v45 }
 0x1fe   : > { %v795_v46 = vpop.xlane.xlu1 %794  ;;  %v816_v47 = vpop.xlane.xlu0 %815 }
 0x1ff   : > { %835 = vst.msk [vmem:[%s1721_s7 + $0x18] sm:$0xff] %vm735_vm0, %v795_v46  ;;  %842 = vst.msk [vmem:[%s1721_s7 + $0x50] sm:$0xff] %vm735_vm0, %v816_v47 }
 0x202   : > { %v819_v48 = vpop.xlane.xlu1 %818  ;;  %v701_v49 = vpop.xlane.xlu0 %700 }
 0x203   : > { %843 = vst.msk [vmem:[%s1721_s7 + $0x58] sm:$0xff] %vm735_vm0, %v819_v48  ;;  %740 = vst.msk [vmem:[%s1710_s6 + $0x20] sm:$0xff] %vm735_vm0, %v701_v49 }
 0x206   : > { %v704_v50 = vpop.xlane.xlu1 %703  ;;  %v725_v51 = vpop.xlane.xlu0 %724 }
 0x207   : > { %741 = vst.msk [vmem:[%s1710_s6 + $0x28] sm:$0xff] %vm735_vm0, %v704_v50  ;;  %748 = vst.msk [vmem:[%s1710_s6 + $0x60] sm:$0xff] %vm735_vm0, %v725_v51 }
 0x20a   : > { %v728_v52 = vpop.xlane.xlu1 %727  ;;  %v798_v53 = vpop.xlane.xlu0 %797 }
 0x20b   : > { %749 = vst.msk [vmem:[%s1710_s6 + $0x68] sm:$0xff] %vm735_vm0, %v728_v52  ;;  %836 = vst.msk [vmem:[%s1721_s7 + $0x20] sm:$0xff] %vm735_vm0, %v798_v53 }
 0x20e   : > { %v801_v54 = vpop.xlane.xlu1 %800  ;;  %v822_v55 = vpop.xlane.xlu0 %821 }
 0x20f   : > { %837 = vst.msk [vmem:[%s1721_s7 + $0x28] sm:$0xff] %vm735_vm0, %v801_v54  ;;  %844 = vst.msk [vmem:[%s1721_s7 + $0x60] sm:$0xff] %vm735_vm0, %v822_v55 }
 0x212   : > { %v825_v56 = vpop.xlane.xlu1 %824  ;;  %v707_v57 = vpop.xlane.xlu0 %706 }
 0x213   : > { %845 = vst.msk [vmem:[%s1721_s7 + $0x68] sm:$0xff] %vm735_vm0, %v825_v56  ;;  %742 = vst.msk [vmem:[%s1710_s6 + $0x30] sm:$0xff] %vm735_vm0, %v707_v57 }
 0x216   : > { %v710_v58 = vpop.xlane.xlu1 %709  ;;  %v731_v59 = vpop.xlane.xlu0 %730 }
 0x217   : > { %743 = vst.msk [vmem:[%s1710_s6 + $0x38] sm:$0xff] %vm735_vm0, %v710_v58  ;;  %750 = vst.msk [vmem:[%s1710_s6 + $0x70] sm:$0xff] %vm735_vm0, %v731_v59 }
 0x21a   : > { %v734_v60 = vpop.xlane.xlu1 %733  ;;  %v804_v61 = vpop.xlane.xlu0 %803 }
 0x21b   : > { %751 = vst.msk [vmem:[%s1710_s6 + $0x78] sm:$0xff] %vm735_vm0, %v734_v60  ;;  %838 = vst.msk [vmem:[%s1721_s7 + $0x30] sm:$0xff] %vm735_vm0, %v804_v61 }
 0x21e   : > { %v807_v62 = vpop.xlane.xlu1 %806  ;;  %v828_v63 = vpop.xlane.xlu0 %827 }
 0x21f   : > { %839 = vst.msk [vmem:[%s1721_s7 + $0x38] sm:$0xff] %vm735_vm0, %v807_v62  ;;  %846 = vst.msk [vmem:[%s1721_s7 + $0x70] sm:$0xff] %vm735_vm0, %v828_v63 }
 0x222   : > { %v831_v1 = vpop.xlane.xlu1 %830 }
 0x223   : > { %847 = vst.msk [vmem:[%s1721_s7 + $0x78] sm:$0xff] %vm735_vm0, %v831_v1 }
 0x224 PF: > { %s903_s27 = sand.u32 1, %s1351_s15   ;;  %p1826_p10 = scmp.ne.s32.totalorder %s1816_s26, 0 }
 0x225   : > { %p1827_p11 = scmp.ge.s32.totalorder %s1371_s20, 2  ;;  %s904_s22 = scalar_lea.sflag [#allocation4], %s903_s27 }
 0x227   : > { %p1164_p0 = pnand %p1827_p11, %p1826_p10 }
 0x229   : > { %1346 = dma.done.wait (!%p1164_p0), %s904_s22, 4096  }
 0x22a   : > { %1348 = vsyncadd (!%p1164_p0), %s904_s22, 4294963200  ;;  %s22_s20 = sadd.s32 1, %s1371_s20   ;;  %s1828_s15 = smov %s1355_s16 }
 0x22b   : > { %p19_p5 = scmp.ge.s32.totalorder %s22_s20, 4   ;;  %s1829_s16 = smov %s1359_s17 }
 0x22c   : > { %s1830_s17 = smov %s1513_s10  ;;  %s1831_s18 = smov %s1367_s19 }
 0x22d   : > { %s1832_s19 = smov %s1834_s5  ;;  %21 = sbr.rel (!%p19_p5) target bundleno = 7 (0x7), region = 110 }
 0x234   :  { %933 = vsyncpa [#allocation3], 1 }
 0x235   :  { %935 = vsyncpa [#allocation3 + $0x1], 1 }
 0x236   :  { %936 = vsyncpa [#allocation6], 1 }
 0x237   :  { %937 = vsyncpa [#allocation4], 1 }
 0x238   :  { %939 = vsyncpa [#allocation4 + $0x1], 1 }

</bundles_post_ra>
